<compile_context>
chip_gen: v6e
topology: v6e:2x2x1
jax: 0.10.0
libtpu: 0.0.40
codegen_flags: <defaults>
</compile_context>

<pallas_src>
import functools

import jax
import jax.numpy as jnp
from jax.experimental import pallas as pl
from jax.experimental.pallas import tpu as pltpu


def _fused_mlp_kernel(params_ref, x_ref, o_ref):
    # params_ref: SMEM f32[4] = [w0, w1, w2, bias]  (folded 3->12->1 MLP)
    # x_ref:      VMEM f32[3, TB]   (batch on the lane axis)
    # o_ref:      VMEM f32[1, TB]
    x = x_ref[...]                                   # (3, TB)
    y = (params_ref[0] * x[0:1, :]
         + params_ref[1] * x[1:2, :]
         + params_ref[2] * x[2:3, :]
         + params_ref[3])                            # (1, TB), pure VPU
    o_ref[...] = y


@functools.partial(jax.jit, static_argnames=("block_b",))
def test_forward(state, w1, b1, w2, b2, *, block_b=1024):
    """Forward pass of `Test` (Linear(3,12) -> Linear(12,1), both with bias).

    state: (B, 3) f32.  Weights are stored transposed relative to PyTorch:
    w1: (3, 12), b1: (1, 12), w2: (12, 1), b2: (1, 1).  Returns (B, 1) f32.
    """
    if block_b % 128 != 0:
        raise ValueError("block_b must be a multiple of 128 (lane width)")
    B = state.shape[0]

    # --- Algebraic collapse (no activation between the two layers) ---------
    #   (x @ w1 + b1) @ w2 + b2  ==  x @ (w1 @ w2) + (b1 @ w2 + b2)
    w = (w1 @ w2).reshape(3)                          # (3,)
    b = (b1 @ w2 + b2).reshape(1)                     # (1,)
    params = jnp.concatenate([w, b]).astype(jnp.float32)   # (4,) -> SMEM

    # --- Lane-dense, batch-major layout ------------------------------------
    n_blocks = pl.cdiv(B, block_b)
    b_pad = n_blocks * block_b
    x_t = jnp.pad(state.astype(jnp.float32),
                  ((0, b_pad - B), (0, 0))).T          # (3, B_pad)

    out = pl.pallas_call(
        _fused_mlp_kernel,
        out_shape=jax.ShapeDtypeStruct((1, b_pad), jnp.float32),
        grid=(n_blocks,),
        in_specs=[
            # Folded weights + bias: 4 scalars in SMEM (no per-step VMEM DMA).
            pl.BlockSpec(memory_space=pltpu.MemorySpace.SMEM),
            # Batch tile, lane dense; sublane dim (3) equals the full dim.
            pl.BlockSpec((3, block_b), lambda i: (0, i)),
        ],
        out_specs=pl.BlockSpec((1, block_b), lambda i: (0, i)),
        compiler_params=pltpu.CompilerParams(
            dimension_semantics=("parallel",),  # shard batch across TCs (v7x)
        ),
    )(params, x_t)

    return out[0, :B].reshape(B, 1)


def init_params(key):
    """Deterministic init matching nn.Linear shapes: l1: 3->12, l2: 12->1.

    PyTorch stores weight as (out, in); we store the transpose (in, out).
    Same uniform(-1/sqrt(fan_in), 1/sqrt(fan_in)) scheme as nn.Linear.
    """
    k1, k2, k3, k4 = jax.random.split(key, 4)
    bound1 = 1.0 / jnp.sqrt(3.0)
    bound2 = 1.0 / jnp.sqrt(12.0)
    w1 = jax.random.uniform(k1, (3, 12), jnp.float32, -bound1, bound1)
    b1 = jax.random.uniform(k2, (1, 12), jnp.float32, -bound1, bound1)
    w2 = jax.random.uniform(k3, (12, 1), jnp.float32, -bound2, bound2)
    b2 = jax.random.uniform(k4, (1, 1), jnp.float32, -bound2, bound2)
    return w1, b1, w2, b2


if __name__ == "__main__":
    key = jax.random.PRNGKey(0)
    k_in, k_par = jax.random.split(key)

    # Non-multiple-of-tile batch exercises padding; block_b=256 -> grid of 4
    # steps to exercise the pipelined / parallel grid path.
    batch = 1000
    state = jax.random.normal(k_in, (batch, 3), dtype=jnp.float32)
    w1, b1, w2, b2 = init_params(k_par)

    out = test_forward(state, w1, b1, w2, b2, block_b=256)
    out = jax.block_until_ready(out)

    # Reference: the original (un-collapsed) two-layer forward in plain JAX.
    ref = (state @ w1 + b1) @ w2 + b2
    assert out.shape == (batch, 1)
    assert jnp.allclose(out, ref, atol=1e-5, rtol=1e-5)

    print("KERNEL_OK")
</pallas_src>

<mosaic_0001>
module attributes {stable_mosaic.version = 11 : i64} {
  func.func @_fused_mlp_kernel(%arg0: i32, %arg1: memref<4xf32, #tpu.memory_space<smem>>, %arg2: memref<3x256xf32, #tpu.memory_space<vmem>>, %arg3: memref<1x256xf32, #tpu.memory_space<vmem>>) attributes {dimension_semantics = [#tpu.dimension_semantics<parallel>], iteration_bounds = array<i64: 4>, scalar_prefetch = 0 : i64, scratch_operands = 0 : i64, tpu.core_type = #tpu.core_type<tc>, window_params = [{transform_indices = @transform_0, window_bounds = array<i64: 4>}, {transform_indices = @transform_1, window_bounds = array<i64: 3, 256>}, {transform_indices = @transform_2, window_bounds = array<i64: 1, 256>}]} {
    %c0 = arith.constant 0 : index
    %c0_0 = arith.constant 0 : index
    %0 = vector.load %arg2[%c0, %c0_0] : memref<3x256xf32, #tpu.memory_space<vmem>>, vector<3x256xf32>
    %c0_1 = arith.constant 0 : index
    %1 = memref.load %arg1[%c0_1] : memref<4xf32, #tpu.memory_space<smem>>
    %2 = vector.extract_strided_slice %0 {offsets = [0, 0], sizes = [1, 256], strides = [1, 1]} : vector<3x256xf32> to vector<1x256xf32>
    %3 = vector.broadcast %1 : f32 to vector<1x256xf32>
    %4 = arith.mulf %3, %2 : vector<1x256xf32>
    %c1 = arith.constant 1 : index
    %5 = memref.load %arg1[%c1] : memref<4xf32, #tpu.memory_space<smem>>
    %6 = vector.extract_strided_slice %0 {offsets = [1, 0], sizes = [1, 256], strides = [1, 1]} : vector<3x256xf32> to vector<1x256xf32>
    %7 = vector.broadcast %5 : f32 to vector<1x256xf32>
    %8 = arith.mulf %7, %6 : vector<1x256xf32>
    %9 = arith.addf %4, %8 : vector<1x256xf32>
    %c2 = arith.constant 2 : index
    %10 = memref.load %arg1[%c2] : memref<4xf32, #tpu.memory_space<smem>>
    %11 = vector.extract_strided_slice %0 {offsets = [2, 0], sizes = [1, 256], strides = [1, 1]} : vector<3x256xf32> to vector<1x256xf32>
    %12 = vector.broadcast %10 : f32 to vector<1x256xf32>
    %13 = arith.mulf %12, %11 : vector<1x256xf32>
    %14 = arith.addf %9, %13 : vector<1x256xf32>
    %c3 = arith.constant 3 : index
    %15 = memref.load %arg1[%c3] : memref<4xf32, #tpu.memory_space<smem>>
    %16 = vector.broadcast %15 : f32 to vector<1x256xf32>
    %17 = arith.addf %14, %16 : vector<1x256xf32>
    %c0_2 = arith.constant 0 : index
    %c0_3 = arith.constant 0 : index
    %18 = vector.load %arg3[%c0_2, %c0_3] : memref<1x256xf32, #tpu.memory_space<vmem>>, vector<1x256xf32>
    tpu.vector_store %arg3[%c0_2, %c0_3], %17 {strides = array<i32>} : memref<1x256xf32, #tpu.memory_space<vmem>>, vector<1x256xf32>,
    return
  }
  func.func @transform_0(%arg0: i32) -> i32 {
    %c0_i32 = arith.constant 0 : i32
    %c0_i32_0 = arith.constant 0 : i32
    return %c0_i32 : i32
  }
  func.func @transform_1(%arg0: i32) -> (i32, i32) {
    %c0_i32 = arith.constant 0 : i32
    %c0_i32_0 = arith.constant 0 : i32
    return %c0_i32, %arg0 : i32, i32
  }
  func.func @transform_2(%arg0: i32) -> (i32, i32) {
    %c0_i32 = arith.constant 0 : i32
    %c0_i32_0 = arith.constant 0 : i32
    return %c0_i32, %arg0 : i32, i32
  }
}

</mosaic_0001>

<bundles_post_ra>
// kernel: test_forward.1
= control target key start
LH: loop header
LB: loop body
LE: loop exit
PB: predicated region body
PF: predicated region fallthrough
CT: control target
= control target key end

     0   :  { %7 = vsyncpa [#allocation3], 0  ;;  %s346_s9 = smov 0   ;;  %s384_s0 = inlined_call_operand.vmem [shape: f32[4], index: 0, kind: input, shape index: {}]   ;;  %s385_s1 = inlined_call_operand.vmem [shape: f32[3,1024], index: 1, kind: input, shape index: {}]   ;;  %s386_s2 = inlined_call_operand.vmem [shape: f32[1,1024], index: 2, kind: output, shape index: {}]  }
   0x1 LB: > { %s265_s10 = sadd.s32 4294967295, %s327_s9   ;;  %p267_p0 = scmp.ge.s32.totalorder %s327_s9, 1  ;;  %s327_s9 = sphi %s346_s9, %s13_s9  }
   0x2   : > { %p91_p1 = scmp.lt.s32.totalorder %s327_s9, 5  ;;  %s104_s13 = sshll.u32 %s384_s0, 4  ;;  %s105_s13 = int_to_ptr.vmem [resolvable:$true] %s104_s13 }
   0x3   : > { %p361_p3 = scmp.eq.s32.totalorder %s265_s10, 0  ;;  %s302_s16 = scalar_lea.vmem %s105_s13, 16 }
   0x4   : > { %p357_p2 = pnand %p267_p0, %p91_p1  ;;  %p303_p6 = scmp.ne.s32.totalorder %s105_s13, %s302_s16 }
   0x5   : > { %p310_p10 = scmp.lt.s32.totalorder %s105_s13, %s105_s13  ;;  %p311_p11 = scmp.lt.s32.totalorder %s302_s16, %s302_s16 }
   0x6   : > { %p286_p4 = pneg %p357_p2 }
   0x7   : > { %p312_p12 = por %p311_p11, %p310_p10 }
   0x8   : > { %p287_p5 = pnand %p361_p3, %p286_p4 }
   0xa   : > { %p304_p7 = pneg %p287_p5 }
   0xc   : > { %p305_p8 = pnand %p304_p7, %p303_p6 }
   0xe   : > { %p306_p9 = pneg %p305_p8 }
  0x10   : > { %p313_p13 = pnand %p312_p12, %p306_p9 }
  0x12   : > { %316 = shalt.err (!%p313_p13)
}
  0x13   : > { %s329_s17 = smov [#allocation2]   ;;  %126 = sbr.rel (%p357_p2) target bundleno = 50 (0x32), region = 28 }
  0x14   : > { %289 = dma.vmem_to_smem (!%p287_p5), %s105_s13, 16, %s329_s17, [#allocation3]  }
  0x18   : > { %322 = dma.done.wait (%p361_p3), [#allocation3], 16  }
  0x19   : > { %324 = vsyncadd (%p361_p3), [#allocation3], 4294967280 }
  0x1a   : > { %132 = sfence }
  0x1b   : > { %s272_s18 = sshll.u32 %s265_s10, 1  ;;  %s160_s19 = sld [smem:[#allocation2]]  ;;  %v330_v1 = vmov 1966171168   ;;  %v186_v3 = vlaneseq }
  0x1c   : > { %p149_p0 = scmp.lt.s32.totalorder %s272_s18, 7  ;;  %s275_s20 = sld [smem:[#allocation2 + $0x1]]  ;;  %v184_v2 = vunpack.c.l.s4 %v330_v1 }
  0x1d   : > { %s277_s21 = sld [smem:[#allocation2 + $0x2]]  ;;  %v187_v12 = vshrl.u32 %v186_v3, 7  ;;  %vm200_vm0 = vcmp.lt.s32.totalorder %v186_v3, 256 }
  0x1e   : > { %s390_s18 = smov (!%p149_p0, %s272_s18), 7  ;;  %s279_s23 = sld [smem:[#allocation2 + $0x3]]  ;;  %v185_v11 = vunpack.c.0.s8 %v184_v2 }
  0x1f   : > { %s273_s22 = sshll.u32 %s390_s18, 2  ;;  %s157_s29 = scalar_lea.vmem %s386_s2, %s390_s18 }
  0x20   : > { %s152_s26 = scalar_lea.vmem %s385_s1, %s273_s22  ;;  %v188_v17 = vsub.s32 %v185_v11, %v187_v12 }
  0x21   : > { %v161_v0 = vstv %s160_s19  ;;  %v159_v4 = vld [vmem:[%s152_s26] sm:$0x77] }
  0x22   : > { %v164_v5 = vstv %s275_s20  ;;  %v162_v6 = vmul.f32 %v161_v0, %v159_v4 }
  0x23   : > { %v165_v7 = vmul.f32 %v164_v5, %v159_v4  ;;  %v172_v8 = vstv %s277_s21 }
  0x24   : > { %v173_v9 = vmul.f32 %v172_v8, %v159_v4  ;;  %v180_v15 = vstv %s279_s23 }
  0x25   : > { %v276_v10 = vrot.slane %v165_v7, 9 }
  0x26   : > { %v278_v13 = vrot.slane %v173_v9, 10 }
  0x27   : > { %v170_v14 = vadd.f32 %v276_v10, %v162_v6 }
  0x29   : > { %v178_v16 = vadd.f32 %v278_v13, %v170_v14 }
  0x2b   : > { %v181_v18 = vadd.f32 %v180_v15, %v178_v16 }
  0x2d   : > { %v189_v19 = vrot.slane %v181_v18, %v188_v17 }
  0x2f   : > { %v196_v20 = vrot.slane %v189_v19, %v188_v17 }
  0x31   : > { %202 = vst.msk [vmem:[%s157_s29] sm:$0x3] %vm200_vm0, %v196_v20 }
  0x32 PF: > { %s13_s9 = sadd.s32 1, %s327_s9  }
  0x33   : > { %p10_p1 = scmp.ge.s32.totalorder %s13_s9, 6  }
  0x35   :  { %12 = sbr.rel (!%p10_p1) target bundleno = 1 (0x1), region = 63 }
  0x3a   :  { %223 = vsyncpa [#allocation3], 1 }
  0x3b   :  { %225 = vsyncpa [#allocation3 + $0x1], 1 }

</bundles_post_ra>
